<compile_context>
chip_gen: v6e
topology: v6e:2x2x1
jax: 0.10.0
libtpu: 0.0.40
codegen_flags: <defaults>
</compile_context>

<pallas_src>
import functools

import jax
import jax.numpy as jnp
from jax.experimental import pallas as pl
from jax.experimental.pallas import tpu as pltpu


_D_IN = 768
_HIDDEN = 100
_HIDDEN_PAD = 128   # pad hidden 100 -> 128 (full-lane vregs / MXU tiles)
_LANE = 128


def _round_up(x, m):
    return (x + m - 1) // m * m


def _cdiv(a, b):
    return (a + b - 1) // b


def _mlp_kernel(x_ref, w1_ref, b1_ref, w2_ref, b2_ref, o_ref):
    # fc1: cast x to bf16 in-kernel (no wrapper-side pass over x), MXU matmul
    # with f32 accumulation; bias + tanh in f32.
    x = x_ref[...].astype(jnp.bfloat16)
    h = jnp.dot(x, w1_ref[...], preferred_element_type=jnp.float32)
    h = jnp.tanh(h + b1_ref[...])                      # b1 is (1, 128)
    # fc2: padded w2 rows are zero so padded hidden lanes contribute nothing;
    # padded b2 entries are -1e30 so padded classes vanish in the softmax.
    logits = jnp.dot(h.astype(jnp.bfloat16), w2_ref[...],
                     preferred_element_type=jnp.float32)
    logits = logits + b2_ref[...]                      # b2 is (1, Cp)
    # numerically stable softmax over the class axis (exact division: the
    # approx reciprocal left row sums off by ~1e-3)
    m = jnp.max(logits, axis=1, keepdims=True)
    e = jnp.exp(logits - m)
    denom = jnp.sum(e, axis=1, keepdims=True)
    o_ref[...] = (e / denom).astype(o_ref.dtype)


def pad_params(w1, b1, w2, b2):
    """Pad/cast parameters once (call OUTSIDE the per-step jitted forward).

    w1: [768, 100], b1: [100] or [1, 100], w2: [100, C], b2: [C] or [1, C].
    Returns bf16 weights padded to 128 lanes and f32 biases (padded classes
    get bias -1e30 so they vanish in the softmax).
    """
    d_in, H = w1.shape
    C = w2.shape[1]
    Hp = _HIDDEN_PAD
    Cp = _round_up(max(C, _LANE), _LANE)

    w1p = jnp.zeros((d_in, Hp), jnp.bfloat16).at[:, :H].set(
        w1.astype(jnp.bfloat16))
    b1p = jnp.zeros((1, Hp), jnp.float32).at[:, :H].set(
        b1.astype(jnp.float32).reshape(1, -1))
    w2p = jnp.zeros((Hp, Cp), jnp.bfloat16).at[:H, :C].set(
        w2.astype(jnp.bfloat16))
    b2p = jnp.full((1, Cp), -1e30, jnp.float32).at[:, :C].set(
        b2.astype(jnp.float32).reshape(1, -1))
    return w1p, b1p, w2p, b2p


@functools.partial(jax.jit, static_argnames=("num_classes", "block_m"))
def mlp_forward(x, w1p, b1p, w2p, b2p, *, num_classes, block_m=1024):
    """x: [B, 768] f32. Padded params from pad_params(). Returns [B, C] f32
    softmax probabilities."""
    B, d_in = x.shape
    assert d_in == _D_IN
    Hp = w1p.shape[1]
    Cp = w2p.shape[1]

    # Batch tile: multiple of 16, capped at block_m (v7x VMEM-safe), and
    # clamped so the grid has >= 2 steps when possible (both v7x TCs busy).
    TM = max(16, min(block_m, _round_up(_cdiv(B, 2), 16)))
    grid = (_cdiv(B, TM),)   # partial last block: Pallas masks the write

    cost = pl.CostEstimate(
        flops=2 * B * d_in * Hp + 2 * B * Hp * Cp,
        transcendentals=B * Hp + B * Cp,               # tanh + exp
        bytes_accessed=(x.size * 4 + w1p.size * 2 + w2p.size * 2
                        + b1p.size * 4 + b2p.size * 4 + B * Cp * 4),
    )

    out = pl.pallas_call(
        _mlp_kernel,
        out_shape=jax.ShapeDtypeStruct((B, Cp), jnp.float32),
        grid=grid,
        in_specs=[
            pl.BlockSpec((TM, d_in), lambda i: (i, 0)),   # x tile (pipelined)
            pl.BlockSpec((d_in, Hp), lambda i: (0, 0)),   # w1 (block-invariant)
            pl.BlockSpec((1, Hp), lambda i: (0, 0)),      # b1
            pl.BlockSpec((Hp, Cp), lambda i: (0, 0)),     # w2
            pl.BlockSpec((1, Cp), lambda i: (0, 0)),      # b2 (+ class mask)
        ],
        out_specs=pl.BlockSpec((TM, Cp), lambda i: (i, 0)),
        compiler_params=pltpu.CompilerParams(
            dimension_semantics=("parallel",)),           # megacore on v7x
        cost_estimate=cost,
    )(x, w1p, b1p, w2p, b2p)

    # lane-dense 128-wide block inside the kernel; trim padded classes here.
    return out[:, :num_classes]


def init_params(key, num_classes):
    """Deterministic init mirroring nn.Linear default (uniform ±1/sqrt(fan_in))."""
    k1, k2, k3, k4 = jax.random.split(key, 4)
    in1, out1 = _D_IN, _HIDDEN
    in2, out2 = _HIDDEN, num_classes
    bound1 = 1.0 / jnp.sqrt(in1)
    bound2 = 1.0 / jnp.sqrt(in2)
    w1 = jax.random.uniform(k1, (in1, out1), jnp.float32, -bound1, bound1)
    b1 = jax.random.uniform(k2, (1, out1), jnp.float32, -bound1, bound1)
    w2 = jax.random.uniform(k3, (in2, out2), jnp.float32, -bound2, bound2)
    b2 = jax.random.uniform(k4, (1, out2), jnp.float32, -bound2, bound2)
    return w1, b1, w2, b2


if __name__ == "__main__":
    num_classes = 10
    batch = 8

    key = jax.random.PRNGKey(0)
    kx, kp = jax.random.split(key)
    x = jax.random.normal(kx, (batch, _D_IN), jnp.float32)
    w1, b1, w2, b2 = init_params(kp, num_classes)

    # Pad/cast parameters once, outside the jitted forward (perf review #6).
    w1p, b1p, w2p, b2p = pad_params(w1, b1, w2, b2)

    out = jax.block_until_ready(
        mlp_forward(x, w1p, b1p, w2p, b2p, num_classes=num_classes))

    # Reference in plain JAX/f32 (same math as the PyTorch module).
    h_ref = jnp.tanh(x @ w1 + b1)
    ref = jax.nn.softmax(h_ref @ w2 + b2, axis=1)

    assert out.shape == (batch, num_classes)
    # bf16 matmul operands -> looser tolerance than pure f32
    assert jnp.allclose(out, ref, atol=1e-2), "mismatch vs reference"
    assert jnp.allclose(jnp.sum(out, axis=1), 1.0, atol=1e-3), "rows not normalized"

    print("KERNEL_OK")
</pallas_src>

<mosaic_0001>
module attributes {stable_mosaic.version = 11 : i64} {
  func.func @_mlp_kernel(%arg0: i32, %arg1: memref<16x768xf32, #tpu.memory_space<vmem>>, %arg2: memref<768x128xbf16, #tpu.memory_space<vmem>>, %arg3: memref<1x128xf32, #tpu.memory_space<vmem>>, %arg4: memref<128x128xbf16, #tpu.memory_space<vmem>>, %arg5: memref<1x128xf32, #tpu.memory_space<vmem>>, %arg6: memref<16x128xf32, #tpu.memory_space<vmem>>) attributes {dimension_semantics = [#tpu.dimension_semantics<parallel>], iteration_bounds = array<i64: 1>, scalar_prefetch = 0 : i64, scratch_operands = 0 : i64, tpu.core_type = #tpu.core_type<tc>, window_params = [{transform_indices = @transform_0, window_bounds = array<i64: 16, 768>}, {pipeline_mode = #tpu.pipeline_mode<synchronous>, transform_indices = @transform_1, window_bounds = array<i64: 768, 128>}, {pipeline_mode = #tpu.pipeline_mode<synchronous>, transform_indices = @transform_2, window_bounds = array<i64: 1, 128>}, {pipeline_mode = #tpu.pipeline_mode<synchronous>, transform_indices = @transform_3, window_bounds = array<i64: 128, 128>}, {pipeline_mode = #tpu.pipeline_mode<synchronous>, transform_indices = @transform_4, window_bounds = array<i64: 1, 128>}, {transform_indices = @transform_5, window_bounds = array<i64: 16, 128>}]} {
    %c0 = arith.constant 0 : index
    %c0_0 = arith.constant 0 : index
    %0 = vector.load %arg1[%c0, %c0_0] : memref<16x768xf32, #tpu.memory_space<vmem>>, vector<16x768xf32>
    %1 = arith.truncf %0 : vector<16x768xf32> to vector<16x768xbf16>
    %c0_1 = arith.constant 0 : index
    %c0_2 = arith.constant 0 : index
    %2 = vector.load %arg2[%c0_1, %c0_2] : memref<768x128xbf16, #tpu.memory_space<vmem>>, vector<768x128xbf16>
    %cst = arith.constant dense<0.000000e+00> : vector<16x128xf32>
    %3 = tpu.matmul %1, %2, %cst {dimension_numbers = #tpu.dot_dimension_numbers<[1], [0], [0], [1], [0, 0, 1, 1], [], []>} : vector<16x768xbf16>, vector<768x128xbf16>, vector<16x128xf32> -> vector<16x128xf32>
    %c0_3 = arith.constant 0 : index
    %c0_4 = arith.constant 0 : index
    %4 = vector.load %arg3[%c0_3, %c0_4] : memref<1x128xf32, #tpu.memory_space<vmem>>, vector<1x128xf32>
    %5 = vector.broadcast %4 : vector<1x128xf32> to vector<16x128xf32>
    %6 = arith.addf %3, %5 : vector<16x128xf32>
    %7 = math.tanh %6 : vector<16x128xf32>
    %8 = arith.truncf %7 : vector<16x128xf32> to vector<16x128xbf16>
    %c0_5 = arith.constant 0 : index
    %c0_6 = arith.constant 0 : index
    %9 = vector.load %arg4[%c0_5, %c0_6] : memref<128x128xbf16, #tpu.memory_space<vmem>>, vector<128x128xbf16>
    %cst_7 = arith.constant dense<0.000000e+00> : vector<16x128xf32>
    %10 = tpu.matmul %8, %9, %cst_7 {dimension_numbers = #tpu.dot_dimension_numbers<[1], [0], [0], [1], [0, 0, 1, 1], [], []>} : vector<16x128xbf16>, vector<128x128xbf16>, vector<16x128xf32> -> vector<16x128xf32>
    %c0_8 = arith.constant 0 : index
    %c0_9 = arith.constant 0 : index
    %11 = vector.load %arg5[%c0_8, %c0_9] : memref<1x128xf32, #tpu.memory_space<vmem>>, vector<1x128xf32>
    %12 = vector.broadcast %11 : vector<1x128xf32> to vector<16x128xf32>
    %13 = arith.addf %10, %12 : vector<16x128xf32>
    %cst_10 = arith.constant dense<0xFF800000> : vector<16xf32>
    %14 = vector.multi_reduction <maximumf>, %13, %cst_10 [1] : vector<16x128xf32> to vector<16xf32>
    %15 = vector.shape_cast %14 : vector<16xf32> to vector<16x1xf32>
    %16 = vector.broadcast %15 : vector<16x1xf32> to vector<16x128xf32>
    %17 = arith.subf %13, %16 : vector<16x128xf32>
    %18 = math.exp %17 : vector<16x128xf32>
    %cst_11 = arith.constant dense<0.000000e+00> : vector<16xf32>
    %19 = vector.multi_reduction <add>, %18, %cst_11 [1] : vector<16x128xf32> to vector<16xf32>
    %20 = vector.shape_cast %19 : vector<16xf32> to vector<16x1xf32>
    %21 = vector.broadcast %20 : vector<16x1xf32> to vector<16x128xf32>
    %22 = arith.divf %18, %21 : vector<16x128xf32>
    %c0_12 = arith.constant 0 : index
    %c0_13 = arith.constant 0 : index
    %23 = vector.load %arg6[%c0_12, %c0_13] : memref<16x128xf32, #tpu.memory_space<vmem>>, vector<16x128xf32>
    tpu.vector_store %arg6[%c0_12, %c0_13], %22 {strides = array<i32>} : memref<16x128xf32, #tpu.memory_space<vmem>>, vector<16x128xf32>,
    return
  }
  func.func @transform_0(%arg0: i32) -> (i32, i32) {
    %c0_i32 = arith.constant 0 : i32
    %c0_i32_0 = arith.constant 0 : i32
    return %arg0, %c0_i32 : i32, i32
  }
  func.func @transform_1(%arg0: i32) -> (i32, i32) {
    %c0_i32 = arith.constant 0 : i32
    %c0_i32_0 = arith.constant 0 : i32
    %c0_i32_1 = arith.constant 0 : i32
    return %c0_i32, %c0_i32_0 : i32, i32
  }
  func.func @transform_2(%arg0: i32) -> (i32, i32) {
    %c0_i32 = arith.constant 0 : i32
    %c0_i32_0 = arith.constant 0 : i32
    %c0_i32_1 = arith.constant 0 : i32
    return %c0_i32, %c0_i32_0 : i32, i32
  }
  func.func @transform_3(%arg0: i32) -> (i32, i32) {
    %c0_i32 = arith.constant 0 : i32
    %c0_i32_0 = arith.constant 0 : i32
    %c0_i32_1 = arith.constant 0 : i32
    return %c0_i32, %c0_i32_0 : i32, i32
  }
  func.func @transform_4(%arg0: i32) -> (i32, i32) {
    %c0_i32 = arith.constant 0 : i32
    %c0_i32_0 = arith.constant 0 : i32
    %c0_i32_1 = arith.constant 0 : i32
    return %c0_i32, %c0_i32_0 : i32, i32
  }
  func.func @transform_5(%arg0: i32) -> (i32, i32) {
    %c0_i32 = arith.constant 0 : i32
    %c0_i32_0 = arith.constant 0 : i32
    return %arg0, %c0_i32 : i32, i32
  }
}

</mosaic_0001>

<bundles_post_ra>
// kernel: mlp_forward.1
= control target key start
LH: loop header
LB: loop body
LE: loop exit
PB: predicated region body
PF: predicated region fallthrough
CT: control target
= control target key end

     0   :  { %10 = vsyncpa [#allocation3], 0  ;;  %s1133_s0 = inlined_call_operand.hbm [shape: f32[8,768], index: 0, kind: input, shape index: {}]   ;;  %s1134_s1 = inlined_call_operand.hbm [shape: bf16[768,128], index: 1, kind: input, shape index: {}]   ;;  %s1135_s2 = inlined_call_operand.vmem [shape: f32[1,128], index: 2, kind: input, shape index: {}]   ;;  %s1136_s3 = inlined_call_operand.hbm [shape: bf16[128,128], index: 3, kind: input, shape index: {}]   ;;  %s1137_s4 = inlined_call_operand.vmem [shape: f32[1,128], index: 4, kind: input, shape index: {}]   ;;  %s1138_s5 = inlined_call_operand.hbm [shape: f32[8,128], index: 5, kind: output, shape index: {}]  }
   0x1   :  { %11 = vsyncpa [#allocation6], 0 }
   0x2   :  { %12 = vsyncpa [#allocation4], 0 }
   0x3   :  { %17 = vsyncadd [#allocation3], 768  ;;  %s1067_s18 = smov [#allocation5]  }
   0x4   :  { %s30_s19 = sshll.u32 %s1067_s18, 4  ;;  %s31_s19 = int_to_ptr.vmem [resolvable:$true] %s30_s19 }
   0x5   :  { %s989_s20 = scalar_lea.vmem %s31_s19, 6144  ;;  %p994_p1 = scmp.lt.s32.totalorder %s31_s19, %s31_s19 }
   0x6   :  { %p990_p0 = scmp.ne.s32.totalorder %s31_s19, %s989_s20  ;;  %p995_p2 = scmp.lt.s32.totalorder %s989_s20, %s989_s20 }
   0x8   :  { %p996_p3 = por %p995_p2, %p994_p1 }
   0xa   :  { %p997_p4 = pnand %p996_p3, %p990_p0 }
   0xc   :  { %1000 = shalt.err (!%p997_p4)
}
   0xd   :  { %s1068_s21 = smov 64   ;;  %s1069_s22 = smov 4  }
   0xe   :  { %36 = dma.hbm_to_vmem [thread:$0]  %s1134_s1, 6144, %s31_s19, [#allocation6], %s1068_s21, %s1068_s21, %s1069_s22  }
   0xf   :  { %s1070_s25 = smov [#allocation2]  }
  0x10   :  { %s18_s26 = sshll.u32 %s1070_s25, 4  ;;  %s19_s26 = int_to_ptr.vmem [resolvable:$true] %s18_s26 }
  0x11   :  { %s1009_s27 = scalar_lea.vmem %s19_s26, 768  ;;  %s1013_s28 = scalar_lea.vmem %s19_s26, 1536 }
  0x12   :  { %p1010_p5 = scmp.ne.s32.totalorder %s19_s26, %s1009_s27  ;;  %p1014_p6 = scmp.lt.s32.totalorder %s19_s26, %s19_s26 }
  0x13   :  { %p1015_p7 = scmp.lt.s32.totalorder %s1013_s28, %s1009_s27 }
  0x15   :  { %p1016_p8 = por %p1015_p7, %p1014_p6 }
  0x17   :  { %p1017_p9 = pnand %p1016_p8, %p1010_p5 }
  0x19   :  { %1020 = shalt.err (!%p1017_p9)
}
  0x1a   :  { %s1071_s29 = smov 768   ;;  %s1072_s30 = smov 48  }
  0x1b   :  { %24 = dma.hbm_to_vmem [thread:$0]  %s1133_s0, 768, %s19_s26, [#allocation3], %s1071_s29, %s1071_s29, %s1072_s30  }
  0x1c   :  { %s1073_s8 = smov [#allocation7]  }
  0x1d   :  { %s44_s9 = sshll.u32 %s1073_s8, 4  ;;  %s45_s9 = int_to_ptr.vmem [resolvable:$true] %s44_s9 }
  0x1e   :  { %s1029_s1 = scalar_lea.vmem %s45_s9, 1024  ;;  %p1034_p11 = scmp.lt.s32.totalorder %s45_s9, %s45_s9 }
  0x1f   :  { %p1030_p10 = scmp.ne.s32.totalorder %s45_s9, %s1029_s1  ;;  %p1035_p12 = scmp.lt.s32.totalorder %s1029_s1, %s1029_s1 }
  0x21   :  { %p1036_p13 = por %p1035_p12, %p1034_p11 }
  0x23   :  { %p1037_p0 = pnand %p1036_p13, %p1030_p10 }
  0x25   :  { %1040 = shalt.err (!%p1037_p0)
}
  0x26   :  { %50 = dma.hbm_to_vmem [thread:$0]  %s1136_s3, 1024, %s45_s9, [#allocation6], %s1068_s21, %s1068_s21, %s1069_s22  }
  0x27   :  { %1061 = dma.done.wait [#allocation3], 1536  }
  0x28   :  { %1062 = vsyncadd [#allocation3], 4294965760 }
  0x29   :  { %1063 = dma.done.wait [#allocation6], 7168  }
  0x2a   :  { %1064 = vsyncadd [#allocation6], 4294960128  ;;  %v913_v0 = vld [vmem:[#allocation5 + $0x78] sm:$0xff]   ;;  %v917_v4 = vld [vmem:[#allocation5 + $0x70] sm:$0xff]   ;;  %vm1075_vm0 = vmmov 0  }
  0x2b   :  { %v914_v1 = vld [vmem:[#allocation5 + $0x38] sm:$0xff]   ;;  %806 = vmatprep.subr.bf16.mxu0 %v913_v0  ;;  %v918_v5 = vld [vmem:[#allocation5 + $0x30] sm:$0xff]   ;;  %v921_v8 = vld [vmem:[#allocation5 + $0x68] sm:$0xff]  }
  0x2c   :  { %v915_v2 = vld [vmem:[#allocation5 + $0xf8] sm:$0xff]   ;;  %807 = vmatpush3.bf16.msra.mxu0 %v914_v1  ;;  %v919_v6 = vld [vmem:[#allocation5 + $0xf0] sm:$0xff]   ;;  %v922_v9 = vld [vmem:[#allocation5 + $0x28] sm:$0xff]  }
  0x2d   :  { %v916_v3 = vld [vmem:[#allocation5 + $0xb8] sm:$0xff]   ;;  %828 = vmatprep.subr.bf16.mxu1 %v915_v2  ;;  %808 = vmatprep.subr.bf16.mxu0 %v917_v4  ;;  %v920_v7 = vld [vmem:[#allocation5 + $0xb0] sm:$0xff]   ;;  %v923_v10 = vld [vmem:[#allocation5 + $0xe8] sm:$0xff]  }
  0x2e   :  { %829 = vmatpush3.bf16.msra.mxu1 %v916_v3  ;;  %v924_v11 = vld [vmem:[#allocation5 + $0xa8] sm:$0xff]   ;;  %v925_v12 = vld [vmem:[#allocation5 + $0x60] sm:$0xff]   ;;  %v929_v16 = vld [vmem:[#allocation5 + $0x58] sm:$0xff]   ;;  %v1074_v3 = vmov 0.0  }
  0x2f   :  { %830 = vmatprep.subr.bf16.mxu1 %v919_v6  ;;  %v926_v13 = vld [vmem:[#allocation5 + $0x20] sm:$0xff]   ;;  %v930_v17 = vld [vmem:[#allocation5 + $0x18] sm:$0xff]   ;;  %v933_v20 = vld [vmem:[#allocation5 + $0x50] sm:$0xff]  }
  0x30   :  { %809 = vmatpush3.bf16.msra.mxu0 %v918_v5  ;;  %v927_v14 = vld [vmem:[#allocation5 + $0xe0] sm:$0xff]   ;;  %v931_v18 = vld [vmem:[#allocation5 + $0xd8] sm:$0xff]   ;;  %v934_v21 = vld [vmem:[#allocation5 + $0x10] sm:$0xff]  }
  0x31   :  { %810 = vmatprep.subr.bf16.mxu0 %v921_v8  ;;  %v928_v15 = vld [vmem:[#allocation5 + $0xa0] sm:$0xff]   ;;  %v932_v19 = vld [vmem:[#allocation5 + $0x98] sm:$0xff]   ;;  %v935_v22 = vld [vmem:[#allocation5 + $0xd0] sm:$0xff]  }
  0x32   :  { %831 = vmatpush3.bf16.msra.mxu1 %v920_v7  ;;  %v936_v23 = vld [vmem:[#allocation5 + $0x90] sm:$0xff]   ;;  %v937_v24 = vld [vmem:[#allocation5 + $0x48] sm:$0xff]   ;;  %v941_v28 = vld [vmem:[#allocation5 + $0x40] sm:$0xff]  }
  0x33   :  { %832 = vmatprep.subr.bf16.mxu1 %v923_v10  ;;  %v938_v25 = vld [vmem:[#allocation5 + $0x8] sm:$0xff]   ;;  %v942_v29 = vld [vmem:[#allocation5] sm:$0xff]   ;;  %v70_v32 = vld [vmem:[#allocation2 + $0x38] sm:$0xff] }
  0x34   :  { %811 = vmatpush3.bf16.msra.mxu0 %v922_v9  ;;  %v939_v26 = vld [vmem:[#allocation5 + $0xc8] sm:$0xff]   ;;  %v943_v30 = vld [vmem:[#allocation5 + $0xc0] sm:$0xff]   ;;  %v69_v36 = vld [vmem:[#allocation2 + $0x30] sm:$0xff] }
  0x35   :  { %812 = vmatprep.subr.bf16.mxu0 %v925_v12  ;;  %v940_v27 = vld [vmem:[#allocation5 + $0x88] sm:$0xff]   ;;  %v944_v34 = vld [vmem:[#allocation5 + $0x80] sm:$0xff]   ;;  %v945_v38 = vld [vmem:[#allocation5 + $0x178] sm:$0xff]  }
  0x36   :  { %833 = vmatpush3.bf16.msra.mxu1 %v924_v11  ;;  %v64_v31 = vld [vmem:[#allocation2 + $0x8] sm:$0xff]  ;;  %v63_v35 = vld [vmem:[#allocation2] sm:$0xff]  ;;  %v66_v39 = vld [vmem:[#allocation2 + $0x18] sm:$0xff] }
  0x37   :  { %834 = vmatprep.subr.bf16.mxu1 %v927_v14  ;;  %v76_v33 = vpack.c.bf16 %v70_v32, %v64_v31  ;;  %v75_v37 = vpack.c.bf16 %v69_v36, %v63_v35  ;;  %v72_v40 = vld [vmem:[#allocation2 + $0x48] sm:$0xff]  ;;  %v946_v42 = vld [vmem:[#allocation5 + $0x138] sm:$0xff]   ;;  %v65_v43 = vld [vmem:[#allocation2 + $0x10] sm:$0xff] }
  0x38   :  { %813 = vmatpush3.bf16.msra.mxu0 %v926_v13  ;;  %v78_v41 = vpack.c.bf16 %v72_v40, %v66_v39  ;;  %v71_v44 = vld [vmem:[#allocation2 + $0x40] sm:$0xff]  ;;  %v947_v46 = vld [vmem:[#allocation5 + $0x170] sm:$0xff]   ;;  %v949_v48 = vld [vmem:[#allocation5 + $0x168] sm:$0xff]  }
  0x39   :  { %814 = vmatprep.subr.bf16.mxu0 %v929_v16  ;;  %504 = vmatprep.mubr.bf16.mxu0 %v76_v33  ;;  %v77_v45 = vpack.c.bf16 %v71_v44, %v65_v43  ;;  %v948_v47 = vld [vmem:[#allocation5 + $0x130] sm:$0xff]   ;;  %v950_v49 = vld [vmem:[#allocation5 + $0x128] sm:$0xff]   ;;  %v951_v50 = vld [vmem:[#allocation5 + $0x160] sm:$0xff]  }
  0x3a   :  { %835 = vmatpush3.bf16.msra.mxu1 %v928_v15  ;;  %545 = vmatprep.mubr.bf16.mxu1 %v78_v41  ;;  %v952_v51 = vld [vmem:[#allocation5 + $0x120] sm:$0xff]   ;;  %v953_v52 = vld [vmem:[#allocation5 + $0x158] sm:$0xff]   ;;  %v955_v54 = vld [vmem:[#allocation5 + $0x150] sm:$0xff]  }
  0x3b   :  { %836 = vmatprep.subr.bf16.mxu1 %v931_v18  ;;  %v954_v53 = vld [vmem:[#allocation5 + $0x118] sm:$0xff]   ;;  %v68_v55 = vld [vmem:[#allocation2 + $0x28] sm:$0xff]  ;;  %v956_v56 = vld [vmem:[#allocation5 + $0x110] sm:$0xff]  }
  0x3c   :  { %815 = vmatpush3.bf16.msra.mxu0 %v930_v17  ;;  %v74_v57 = vld [vmem:[#allocation2 + $0x58] sm:$0xff]  ;;  %v957_v58 = vld [vmem:[#allocation5 + $0x148] sm:$0xff]   ;;  %v959_v61 = vld [vmem:[#allocation5 + $0x140] sm:$0xff]  }
  0x3d   :  { %816 = vmatprep.subr.bf16.mxu0 %v933_v20  ;;  %v80_v59 = vpack.c.bf16 %v74_v57, %v68_v55  ;;  %v958_v60 = vld [vmem:[#allocation5 + $0x108] sm:$0xff]   ;;  %v960_v62 = vld [vmem:[#allocation5 + $0x100] sm:$0xff]   ;;  %v73_v0 = vld [vmem:[#allocation2 + $0x50] sm:$0xff] }
  0x3e   :  { %837 = vmatpush3.bf16.msra.mxu1 %v932_v19  ;;  %v67_v63 = vld [vmem:[#allocation2 + $0x20] sm:$0xff]  ;;  %v961_v2 = vld [vmem:[#allocation7 + $0x38] sm:$0xff]   ;;  %v962_v4 = vld [vmem:[#allocation7 + $0x30] sm:$0xff]  }
  0x3f   :  { %838 = vmatprep.subr.bf16.mxu1 %v935_v22  ;;  %v79_v1 = vpack.c.bf16 %v73_v0, %v67_v63  ;;  %v963_v5 = vld [vmem:[#allocation7 + $0x28] sm:$0xff]   ;;  %v964_v6 = vld [vmem:[#allocation7 + $0x20] sm:$0xff]   ;;  %v965_v7 = vld [vmem:[#allocation7 + $0x18] sm:$0xff]  }
  0x40   :  { %817 = vmatpush3.bf16.msra.mxu0 %v934_v21  ;;  %v966_v8 = vld [vmem:[#allocation7 + $0x10] sm:$0xff]   ;;  %v967_v9 = vld [vmem:[#allocation7 + $0x8] sm:$0xff]   ;;  %v968_v10 = vld [vmem:[#allocation7] sm:$0xff]  }
  0x41   :  { %818 = vmatprep.subr.bf16.mxu0 %v937_v24  ;;  %v748_v19 = vld [vmem:[%s1135_s2] ss:$0 sm:$0xff] }
  0x42   :  { %839 = vmatpush3.bf16.msra.mxu1 %v936_v23  ;;  %v797_v39 = vld [vmem:[%s1137_s4] ss:$0 sm:$0xff] }
  0x43   :  { %840 = vmatprep.subr.bf16.mxu1 %v939_v26 }
  0x44   :  { %819 = vmatpush3.bf16.msra.mxu0 %v938_v25 }
  0x45   :  { %820 = vmatprep.subr.bf16.mxu0 %v941_v28 }
  0x46   :  { %841 = vmatpush3.bf16.msra.mxu1 %v940_v27 }
  0x47   :  { %842 = vmatprep.subr.bf16.mxu1 %v943_v30 }
  0x48   :  { %821 = vmatpush3.bf16.msra.mxu0 %v942_v29 }
  0x49   :  { %850 = vmatprep.subr.bf16.mxu0 %v945_v38 }
  0x4a   :  { %843 = vmatpush3.bf16.msra.mxu1 %v944_v34 }
  0x4b   :  { %505 = vmatmul.mubr.bf16.vlgmr.msra.gmra.mxu0 %v75_v37  ;;  %881 = vmatprep.subr.bf16.mxu1 %v1074_v3 }
  0x4c   :  { %851 = vmatpush3.bf16.msra.mxu0 %v946_v42  ;;  %586 = vmatprep.mubr.bf16.mxu0 %v80_v59 }
  0x4d   :  { %546 = vmatmul.mubr.bf16.vlgmr.msra.gmra.mxu1 %v77_v45  ;;  %852 = vmatprep.subr.bf16.mxu0 %v947_v46 }
  0x4e   :  { %882 = vmatpush3.bf16.msra.mxu1 %v961_v2  ;;  %897 = vmatprep.mubr.msk.bf16.mxu1 %vm1075_vm0, %v1074_v3 }
  0x4f   :  { %883 = vmatprep.subr.bf16.mxu1 %v1074_v3 }
  0x50   :  { %853 = vmatpush3.bf16.msra.mxu0 %v948_v47 }
  0x51   :  { %854 = vmatprep.subr.bf16.mxu0 %v949_v48 }
  0x52   :  { %884 = vmatpush3.bf16.msra.mxu1 %v962_v4 }
  0x53   :  { %885 = vmatprep.subr.bf16.mxu1 %v1074_v3 }
  0x54   :  { %855 = vmatpush3.bf16.msra.mxu0 %v950_v49 }
  0x55   :  { %856 = vmatprep.subr.bf16.mxu0 %v951_v50 }
  0x56   :  { %886 = vmatpush3.bf16.msra.mxu1 %v963_v5 }
  0x57   :  { %887 = vmatprep.subr.bf16.mxu1 %v1074_v3 }
  0x58   :  { %857 = vmatpush3.bf16.msra.mxu0 %v952_v51 }
  0x59   :  { %858 = vmatprep.subr.bf16.mxu0 %v953_v52 }
  0x5a   :  { %888 = vmatpush3.bf16.msra.mxu1 %v964_v6 }
  0x5b   :  { %889 = vmatprep.subr.bf16.mxu1 %v1074_v3 }
  0x5c   :  { %859 = vmatpush3.bf16.msra.mxu0 %v954_v53 }
  0x5d   :  { %860 = vmatprep.subr.bf16.mxu0 %v955_v54 }
  0x5e   :  { %890 = vmatpush3.bf16.msra.mxu1 %v965_v7 }
  0x5f   :  { %891 = vmatprep.subr.bf16.mxu1 %v1074_v3 }
  0x60   :  { %861 = vmatpush3.bf16.msra.mxu0 %v956_v56 }
  0x61   :  { %862 = vmatprep.subr.bf16.mxu0 %v957_v58 }
  0x62   :  { %892 = vmatpush3.bf16.msra.mxu1 %v966_v8 }
  0x63   :  { %893 = vmatprep.subr.bf16.mxu1 %v1074_v3 }
  0x64   :  { %863 = vmatpush3.bf16.msra.mxu0 %v958_v60 }
  0x65   :  { %864 = vmatprep.subr.bf16.mxu0 %v959_v61 }
  0x66   :  { %894 = vmatpush3.bf16.msra.mxu1 %v967_v9 }
  0x67   :  { %895 = vmatprep.subr.bf16.mxu1 %v1074_v3 }
  0x68   :  { %865 = vmatpush3.bf16.msra.mxu0 %v960_v62 }
  0x6a   :  { %896 = vmatpush3.bf16.msra.mxu1 %v968_v10 }
  0x6b   :  { %587 = vmatmul.mubr.bf16.vlgmr.msra.gmra.mxu0 %v79_v1 }
 0x10b   :  { %v822_v11 = vpop.f32.mrf.mxu0 }
 0x10d   :  { %v823_v12 = vpop.f32.mrf.mxu0  ;;  %v844_v13 = vpop.f32.mrf.mxu1 }
 0x10e   :  { %v824_v16 = vadd.f32 %v823_v12, %v822_v11 }
 0x10f   :  { %v825_v14 = vpop.f32.mrf.mxu0  ;;  %v845_v15 = vpop.f32.mrf.mxu1 }
 0x110   :  { %v507_v21 = vadd.f32 %v824_v16, %v748_v19  ;;  %v846_v22 = vadd.f32 %v845_v15, %v844_v13 }
 0x111   :  { %v826_v17 = vpop.f32.mrf.mxu0  ;;  %v847_v18 = vpop.f32.mrf.mxu1 }
 0x112   :  { %v827_v20 = vadd.f32 %v826_v17, %v825_v14  ;;  %v548_v29 = vadd.f32 %v846_v22, %v507_v21 }
 0x113   :  { %v848_v23 = vpop.f32.mrf.mxu1 }
 0x114   :  { %v510_v26 = vadd.f32 %v827_v20, %v748_v19  ;;  %v849_v27 = vadd.f32 %v848_v23, %v847_v18 }
 0x116   :  { %v551_v33 = vadd.f32 %v849_v27, %v510_v26 }
 0x12b   :  { %v866_v24 = vpop.f32.mrf.mxu0 }
 0x12d   :  { %v867_v25 = vpop.f32.mrf.mxu0 }
 0x12e   :  { %v868_v28 = vadd.f32 %v867_v25, %v866_v24 }
 0x12f   :  { %v869_v30 = vpop.f32.mrf.mxu0 }
 0x130   :  { %v589_v31 = vadd.f32 %v868_v28, %v548_v29 }
 0x131   :  { %v870_v32 = vpop.f32.mrf.mxu0 }
 0x132   :  { %v871_v34 = vadd.f32 %v870_v32, %v869_v30  ;;  %969 = vtanh.f32 %v589_v31 }
 0x134   :  { %v592_v35 = vadd.f32 %v871_v34, %v551_v33 }
 0x136   :  { %971 = vtanh.f32 %v592_v35 }
 0x13f   :  { %v970_v36 = vpop.eup %969 }
 0x143   :  { %v972_v37 = vpop.eup %971 }
 0x144   :  { %v597_v38 = vpack.c.bf16 %v972_v37, %v970_v36 }
 0x146   :  { %898 = vmatmul.mubr.bf16.vlgmr.msra.gmra.mxu1 %v597_v38 }
 0x206   :  { %v703_v40 = vpop.f32.mrf.mxu1 }
 0x207   :  { %v704_v41 = vadd.f32 %v797_v39, %v703_v40 }
 0x208   :  { %v899_v42 = vpop.f32.mrf.mxu1 }
 0x209   :  { %710 = vmax.xlane.f32.xlu0 %v704_v41 }
 0x20a   :  { %v706_v43 = vpop.f32.mrf.mxu1 }
 0x20b   :  { %v707_v44 = vadd.f32 %v797_v39, %v706_v43 }
 0x20c   :  { %v900_v45 = vpop.f32.mrf.mxu1 }
 0x20d   :  { %712 = vmax.xlane.f32.xlu0 %v707_v44 }
 0x292   :  { %v711_v46 = vpop.xlane.xlu0 %710 }
 0x293   :  { %v714_v47 = vsub.f32 %v704_v41, %v711_v46 }
 0x295   :  { %v716_v48 = vmul.f32 1.442695, %v714_v47 }
 0x296   :  { %v713_v49 = vpop.xlane.xlu0 %712 }
 0x297   :  { %973 = vpow2.f32 %v716_v48  ;;  %v715_v50 = vsub.f32 %v707_v44, %v713_v49 }
 0x299   :  { %v718_v51 = vmul.f32 1.442695, %v715_v50 }
 0x29b   :  { %975 = vpow2.f32 %v718_v51 }
 0x2a4   :  { %v974_v52 = vpop.eup %973 }
 0x2a5   :  { %720 = vadd.xlane.f32.xlu1 %v974_v52 }
 0x2a8   :  { %v976_v53 = vpop.eup %975 }
 0x2a9   :  { %722 = vadd.xlane.f32.xlu1 %v976_v53 }
 0x32e   :  { %v721_v54 = vpop.xlane.xlu1 %720 }
 0x32f   :  { %977 = vrcp.f32 %v721_v54 }
 0x332   :  { %v723_v55 = vpop.xlane.xlu1 %722 }
 0x333   :  { %979 = vrcp.f32 %v723_v55 }
 0x33c   :  { %v978_v56 = vpop.eup %977 }
 0x33d   :  { %v725_v57 = vmul.f32 %v978_v56, %v974_v52 }
 0x33f   :  { %728 = vst [vmem:[#allocation8] sm:$0xff] %v725_v57 }
 0x340   :  { %v980_v58 = vpop.eup %979 }
 0x341   :  { %v727_v59 = vmul.f32 %v980_v58, %v976_v53 }
 0x343   :  { %729 = vst [vmem:[#allocation8 + $0x8] sm:$0xff] %v727_v59 }
 0x344   :  { %734 = vsyncadd [#allocation4], 128  ;;  %s1076_s4 = smov [#allocation8]  }
 0x345   :  { %s735_s13 = sshll.u32 %s1076_s4, 4  ;;  %s736_s13 = int_to_ptr.vmem [resolvable:$true] %s735_s13 }
 0x346   :  { %s1041_s14 = scalar_lea.vmem %s736_s13, 128  ;;  %s1045_s15 = scalar_lea.vmem %s736_s13, 256 }
 0x347   :  { %p1042_p1 = scmp.ne.s32.totalorder %s736_s13, %s1041_s14  ;;  %p1046_p2 = scmp.lt.s32.totalorder %s736_s13, %s736_s13 }
 0x348   :  { %p1047_p3 = scmp.lt.s32.totalorder %s1045_s15, %s1041_s14 }
 0x34a   :  { %p1048_p4 = por %p1047_p3, %p1046_p2 }
 0x34c   :  { %p1049_p5 = pnand %p1048_p4, %p1042_p1 }
 0x34e   :  { %1052 = shalt.err (!%p1049_p5)
}
 0x34f   :  { %s1077_s16 = smov 128   ;;  %s1078_s17 = smov 8  }
 0x350   :  { %741 = dma.vmem_to_hbm [thread:$0]  %s736_s13, 128, %s1138_s5, [#allocation4], %s1077_s16, %s1077_s16, %s1078_s17  }
 0x351   :  { %1065 = dma.done.wait [#allocation4], 256  }
 0x352   :  { %1066 = vsyncadd [#allocation4], 4294967040 }
 0x353   :  { %745 = vsyncpa [#allocation3], 1 }
 0x354   :  { %746 = vsyncpa [#allocation6], 1 }
 0x355   :  { %747 = vsyncpa [#allocation4], 1 }

</bundles_post_ra>
